<compile_context>
chip_gen: v7x
topology: tpu7x:2x2x1
jax: 0.10.0
libtpu: 0.0.40
codegen_flags: <defaults>
</compile_context>

<pallas_src>
import functools
import math

import jax
import jax.numpy as jnp
from jax import lax
from jax.experimental import pallas as pl
from jax.experimental.pallas import tpu as pltpu


def _round_up(x, m):
    return ((x + m - 1) // m) * m


def _tpu_caps():
    """Best-effort per-generation VMEM budget / limit and TensorCore count."""
    kind = ""
    try:
        kind = jax.devices()[0].device_kind.lower()
    except Exception:
        pass
    if "v7" in kind or "7x" in kind:
        # 64 MiB physical VMEM per TC, 2 TCs per chip.
        return {"budget": 40 << 20, "vmem_limit": 52 << 20, "num_tc": 2}
    if "v5 lite" in kind or "v5e" in kind or "v5lite" in kind:
        # 128 MiB physical but only 16 MiB default scoped VMEM -> raise explicitly.
        return {"budget": 88 << 20, "vmem_limit": 100 << 20, "num_tc": 1}
    if "v6" in kind:
        return {"budget": 88 << 20, "vmem_limit": 100 << 20, "num_tc": 1}
    # Unknown device: conservative caps that fit every TPU generation.
    return {"budget": 40 << 20, "vmem_limit": 52 << 20, "num_tc": 1}


def _arc_margin_kernel(*refs, s, cos_m, sin_m, th, mm, easy_margin, use_label):
    if use_label:
        hit_ref, xn_ref, w_ref, label_ref, out_ref = refs
    else:
        xn_ref, w_ref, out_ref = refs

    xn = xn_ref[...]                      # [B, D]   matmul dtype (resident)
    w = w_ref[...]                        # [TC, D]  matmul dtype (streamed)
    tc = w.shape[0]

    # sum_j w[c, j]^2 as a (1, TC) row: one cheap extra MXU pass with f32
    # accumulation.  Result is already lane-major (no relayout) and the streamed
    # tile is never materialized in f32.
    wsq = w * w
    sumsq = lax.dot_general(
        jnp.ones((1, wsq.shape[1]), wsq.dtype), wsq,
        dimension_numbers=(((1,), (1,)), ((), ())),
        preferred_element_type=jnp.float32)                    # [1, TC] f32
    inv_wnorm = lax.rsqrt(jnp.maximum(sumsq, 1e-24))           # == 1/max(||w||,1e-12)

    # cosine = xn @ w.T  (RHS-contracted, no transpose), W row norm folded in
    # after the f32 accumulation -> no per-element rescale of the W stream.
    cosine = lax.dot_general(
        xn, w,
        dimension_numbers=(((1,), (1,)), ((), ())),
        preferred_element_type=jnp.float32) * inv_wnorm        # [B, TC] f32

    if not use_label:
        out_ref[...] = cosine.astype(out_ref.dtype)
        return

    c = pl.program_id(0)
    tile_has_label = hit_ref[c] != 0

    @pl.when(tile_has_label)
    def _():
        sine = jnp.sqrt(jnp.clip(1.0 - cosine * cosine, 0.0, 1.0))
        phi = cosine * cos_m - sine * sin_m
        if easy_margin:
            phi = jnp.where(cosine > 0.0, phi, cosine)
        else:
            phi = jnp.where(cosine > th, phi, cosine - mm)
        col_ids = lax.broadcasted_iota(jnp.int32, cosine.shape, 1) + c * tc
        mask = col_ids == label_ref[...]                       # (B,TC) vs (B,1)
        out_ref[...] = (jnp.where(mask, phi, cosine) * s).astype(out_ref.dtype)

    @pl.when(jnp.logical_not(tile_has_label))
    def _():
        # No label column in this tile -> skip all the margin VPU/EUP work.
        out_ref[...] = (cosine * s).astype(out_ref.dtype)


def arc_margin_product(x, weight, label=None, *, s=8.0, m=0.1, easy_margin=False,
                       tile_c=None, matmul_dtype=jnp.bfloat16,
                       out_dtype=jnp.float32):
    """ArcFace margin head.  x: [B, D], weight: [C, D], label: [B] int or None."""
    B, D = x.shape
    C, Dw = weight.shape
    assert D == Dw

    caps = _tpu_caps()
    dsize = jnp.dtype(matmul_dtype).itemsize
    osize = jnp.dtype(out_dtype).itemsize

    # ---- one-time prep (outside the kernel; not redone per C tile) ----------
    x32 = x.astype(jnp.float32)
    xnorm = jnp.sqrt(jnp.sum(x32 * x32, axis=-1, keepdims=True))
    xn = (x32 / jnp.maximum(xnorm, 1e-12)).astype(matmul_dtype)
    w_in = weight.astype(matmul_dtype)          # bf16 halves the dominant W HBM stream

    # Align the contraction dim to 128 (MXU) by zero-padding columns
    # (zero columns change neither norms nor dot products).
    d_pad = _round_up(D, 128)
    if d_pad != D:
        xn = jnp.pad(xn, ((0, 0), (0, d_pad - D)))
        w_in = jnp.pad(w_in, ((0, 0), (0, d_pad - D)))

    # ---- lane-dense class-dim tile, sized from the generation VMEM budget ---
    c128 = _round_up(C, 128)
    if tile_c is not None:
        tc = _round_up(min(max(int(tile_c), 1), c128), 128)
    else:
        resident = 2 * B * d_pad * dsize + 2 * B * 4 + (1 << 20)   # xn + label + slack
        per_row = 2 * (d_pad * dsize + B * osize)                  # dbl-buffered W + out
        avail = max(caps["budget"] - resident, 128 * per_row)
        tc = max(128, (avail // per_row) // 128 * 128)
        tc = min(tc, c128)
        if caps["num_tc"] > 1:
            # Keep >= num_tc tiles so the "parallel" axis feeds every TensorCore.
            tc = min(tc, max(128, _round_up(pl.cdiv(c128, caps["num_tc"]), 128)))
    c_pad = _round_up(C, tc)
    if c_pad != C:
        # Zero rows -> cosine 0 there; never matches a label; sliced off below.
        w_in = jnp.pad(w_in, ((0, c_pad - C), (0, 0)))
    n_c = c_pad // tc

    use_label = label is not None
    kernel = functools.partial(
        _arc_margin_kernel,
        s=float(s), cos_m=math.cos(m), sin_m=math.sin(m),
        th=math.cos(math.pi - m), mm=math.sin(math.pi - m) * m,
        easy_margin=easy_margin, use_label=use_label)

    if use_label:
        label32 = label.astype(jnp.int32)
        # Per-tile "does any label land in this tile" flag, scalar-prefetched to SMEM.
        hits = jnp.zeros((n_c,), jnp.int32).at[label32 // tc].add(1)
        grid_spec = pltpu.PrefetchScalarGridSpec(
            num_scalar_prefetch=1, grid=(n_c,),
            in_specs=[
                pl.BlockSpec((B, d_pad), lambda c, hits: (0, 0)),    # xn: resident
                pl.BlockSpec((tc, d_pad), lambda c, hits: (c, 0)),   # W : streamed
                pl.BlockSpec((B, 1), lambda c, hits: (0, 0)),        # label: resident
            ],
            out_specs=pl.BlockSpec((B, tc), lambda c, hits: (0, c)),
        )
        args = (hits, xn, w_in, label32.reshape(B, 1))
    else:
        grid_spec = pltpu.PrefetchScalarGridSpec(
            num_scalar_prefetch=0, grid=(n_c,),
            in_specs=[
                pl.BlockSpec((B, d_pad), lambda c: (0, 0)),
                pl.BlockSpec((tc, d_pad), lambda c: (c, 0)),
            ],
            out_specs=pl.BlockSpec((B, tc), lambda c: (0, c)),
        )
        args = (xn, w_in)

    # Explicit VMEM limit: covers double-buffered W + out tiles + resident xn,
    # capped per generation (v7x 64 MiB physical; v5e default scoped is only 16 MiB).
    vmem_need = (2 * tc * d_pad * dsize + 2 * B * tc * osize
                 + 2 * B * d_pad * dsize + (2 << 20))
    vmem_limit = int(min(caps["vmem_limit"], max(vmem_need, 32 << 20)))

    cost = pl.CostEstimate(
        flops=2 * B * c_pad * d_pad + 2 * c_pad * d_pad
              + (10 * B * c_pad if use_label else 0),
        transcendentals=c_pad + (B * c_pad if use_label else 0),
        bytes_accessed=(B * d_pad * dsize + c_pad * d_pad * dsize
                        + B * c_pad * osize + (4 * B + 4 * n_c if use_label else 0)),
    )

    out = pl.pallas_call(
        kernel,
        out_shape=jax.ShapeDtypeStruct((B, c_pad), out_dtype),
        grid_spec=grid_spec,
        compiler_params=pltpu.CompilerParams(
            dimension_semantics=("parallel",),       # shard C tiles across TCs (v7x)
            vmem_limit_bytes=vmem_limit),
        cost_estimate=cost,
    )(*args)

    if c_pad != C:
        out = out[:, :C]
    return out


def _reference(x, weight, label, s, m, easy_margin):
    """Pure-JAX reference with the exact PyTorch semantics."""
    xn = x / jnp.maximum(jnp.linalg.norm(x, axis=1, keepdims=True), 1e-12)
    wn = weight / jnp.maximum(jnp.linalg.norm(weight, axis=1, keepdims=True), 1e-12)
    cosine = xn @ wn.T
    if label is None:
        return cosine
    sine = jnp.sqrt(jnp.clip(1.0 - cosine ** 2, 0.0, 1.0))
    phi = cosine * math.cos(m) - sine * math.sin(m)
    if easy_margin:
        phi = jnp.where(cosine > 0.0, phi, cosine)
    else:
        phi = jnp.where(cosine > math.cos(math.pi - m), phi,
                        cosine - math.sin(math.pi - m) * m)
    one_hot = jax.nn.one_hot(label, weight.shape[0], dtype=jnp.float32)
    return s * (one_hot * phi + (1.0 - one_hot) * cosine)


if __name__ == "__main__":
    in_features = 96          # not a multiple of 128 -> exercises D padding
    out_features = 200        # not a multiple of the tile -> exercises C padding + slicing
    batch = 6

    key = jax.random.PRNGKey(0)
    kx, kw, kl = jax.random.split(key, 3)

    x = jax.random.normal(kx, (batch, in_features), dtype=jnp.float32)
    bound = math.sqrt(6.0 / (in_features + out_features))      # nn.init.xavier_uniform_
    weight = jax.random.uniform(kw, (out_features, in_features), jnp.float32,
                                minval=-bound, maxval=bound)
    label = jax.random.randint(kl, (batch,), 0, out_features, dtype=jnp.int32)

    ref_out = _reference(x, weight, label, 8.0, 0.1, False)
    ref_cos = _reference(x, weight, None, 8.0, 0.1, False)
    ref_easy = _reference(x, weight, label, 8.0, 0.1, True)

    # f32 matmul path, explicit 128-wide tiles (2 C tiles -> per-tile hit gating).
    out_f32 = jax.block_until_ready(
        arc_margin_product(x, weight, label, s=8.0, m=0.1, easy_margin=False,
                           tile_c=128, matmul_dtype=jnp.float32))
    cos_f32 = jax.block_until_ready(
        arc_margin_product(x, weight, None, tile_c=128, matmul_dtype=jnp.float32))
    easy_f32 = jax.block_until_ready(
        arc_margin_product(x, weight, label, s=8.0, m=0.1, easy_margin=True,
                           tile_c=128, matmul_dtype=jnp.float32))

    # Default bf16 matmul + auto (generation-aware) tile selection.
    out_bf16 = jax.block_until_ready(
        arc_margin_product(x, weight, label, s=8.0, m=0.1, easy_margin=False))
    cos_bf16 = jax.block_until_ready(arc_margin_product(x, weight, None))

    # Optional bf16 output (halves writeback) with exact f32 matmul operands.
    out_bf16o = jax.block_until_ready(
        arc_margin_product(x, weight, label, s=8.0, m=0.1, easy_margin=False,
                           matmul_dtype=jnp.float32, out_dtype=jnp.bfloat16))

    assert out_f32.shape == (batch, out_features)
    assert cos_f32.shape == (batch, out_features)
    assert jnp.allclose(cos_f32, ref_cos, atol=1e-3), "cosine mismatch (f32)"
    assert jnp.allclose(out_f32, ref_out, atol=1e-3), "margin output mismatch (f32)"
    assert jnp.allclose(easy_f32, ref_easy, atol=2e-3), "easy-margin mismatch (f32)"
    # bf16 operands -> cosine differs from the f32 reference at ~1e-3..1e-2 * s.
    assert jnp.allclose(out_bf16, ref_out, atol=1e-1), "margin output mismatch (bf16)"
    assert jnp.allclose(cos_bf16, ref_cos, atol=3e-2), "cosine mismatch (bf16)"
    assert jnp.allclose(out_bf16o.astype(jnp.float32), ref_out, atol=6e-2), \
        "margin output mismatch (bf16 output)"

    print("KERNEL_OK")
</pallas_src>

<mosaic_0001>
module attributes {stable_mosaic.version = 11 : i64} {
  func.func @_arc_margin_kernel(%arg0: i32, %arg1: memref<2xi32, #tpu.memory_space<smem>>, %arg2: memref<6x128xf32, #tpu.memory_space<vmem>>, %arg3: memref<128x128xf32, #tpu.memory_space<vmem>>, %arg4: memref<6x1xi32, #tpu.memory_space<vmem>>, %arg5: memref<6x128xf32, #tpu.memory_space<vmem>>) attributes {dimension_semantics = [#tpu.dimension_semantics<parallel>], iteration_bounds = array<i64: 2>, scalar_prefetch = 1 : i64, scratch_operands = 0 : i64, tpu.core_type = #tpu.core_type<tc>, window_params = [{pipeline_mode = #tpu.pipeline_mode<synchronous>, transform_indices = @transform_0, window_bounds = array<i64: 6, 128>}, {transform_indices = @transform_1, window_bounds = array<i64: 128, 128>}, {pipeline_mode = #tpu.pipeline_mode<synchronous>, transform_indices = @transform_2, window_bounds = array<i64: 6, 1>}, {transform_indices = @transform_3, window_bounds = array<i64: 6, 128>}]} {
    %c0 = arith.constant 0 : index
    %c0_0 = arith.constant 0 : index
    %0 = vector.load %arg2[%c0, %c0_0] : memref<6x128xf32, #tpu.memory_space<vmem>>, vector<6x128xf32>
    %c0_1 = arith.constant 0 : index
    %c0_2 = arith.constant 0 : index
    %1 = vector.load %arg3[%c0_1, %c0_2] : memref<128x128xf32, #tpu.memory_space<vmem>>, vector<128x128xf32>
    %2 = arith.mulf %1, %1 : vector<128x128xf32>
    %cst = arith.constant 1.000000e+00 : f32
    %3 = vector.broadcast %cst : f32 to vector<1x128xf32>
    %cst_3 = arith.constant dense<0.000000e+00> : vector<1x128xf32>
    %4 = tpu.matmul %3, %2, %cst_3 {dimension_numbers = #tpu.dot_dimension_numbers<[1], [1], [0], [0], [0, 0, 1, 0], [], []>} : vector<1x128xf32>, vector<128x128xf32>, vector<1x128xf32> -> vector<1x128xf32>
    %cst_4 = arith.constant 1.000000e-24 : f32
    %5 = vector.broadcast %cst_4 : f32 to vector<1x128xf32>
    %6 = arith.maximumf %4, %5 : vector<1x128xf32>
    %7 = math.rsqrt %6 : vector<1x128xf32>
    %cst_5 = arith.constant dense<0.000000e+00> : vector<6x128xf32>
    %8 = tpu.matmul %0, %1, %cst_5 {dimension_numbers = #tpu.dot_dimension_numbers<[1], [1], [0], [0], [0, 0, 1, 0], [], []>} : vector<6x128xf32>, vector<128x128xf32>, vector<6x128xf32> -> vector<6x128xf32>
    %9 = vector.broadcast %7 : vector<1x128xf32> to vector<6x128xf32>
    %10 = arith.mulf %8, %9 : vector<6x128xf32>
    %11 = arith.index_cast %arg0 : i32 to index
    %12 = memref.load %arg1[%11] : memref<2xi32, #tpu.memory_space<smem>>
    %c0_i32 = arith.constant 0 : i32
    %13 = arith.cmpi ne, %12, %c0_i32 : i32
    %14 = arith.extui %13 : i1 to i32
    %c0_i32_6 = arith.constant 0 : i32
    %15 = arith.cmpi ne, %14, %c0_i32_6 : i32
    scf.if %15 {
      %19 = arith.mulf %10, %10 : vector<6x128xf32>
      %cst_8 = arith.constant 1.000000e+00 : f32
      %20 = vector.broadcast %cst_8 : f32 to vector<6x128xf32>
      %21 = arith.subf %20, %19 : vector<6x128xf32>
      %cst_9 = arith.constant 0.000000e+00 : f32
      %cst_10 = arith.constant 1.000000e+00 : f32
      %22 = vector.broadcast %cst_9 : f32 to vector<6x128xf32>
      %23 = arith.maximumf %22, %21 : vector<6x128xf32>
      %24 = vector.broadcast %cst_10 : f32 to vector<6x128xf32>
      %25 = arith.minimumf %24, %23 : vector<6x128xf32>
      %26 = math.sqrt %25 : vector<6x128xf32>
      %cst_11 = arith.constant 0.995004177 : f32
      %27 = vector.broadcast %cst_11 : f32 to vector<6x128xf32>
      %28 = arith.mulf %10, %27 : vector<6x128xf32>
      %cst_12 = arith.constant 0.0998334139 : f32
      %29 = vector.broadcast %cst_12 : f32 to vector<6x128xf32>
      %30 = arith.mulf %26, %29 : vector<6x128xf32>
      %31 = arith.subf %28, %30 : vector<6x128xf32>
      %cst_13 = arith.constant -0.995004177 : f32
      %32 = vector.broadcast %cst_13 : f32 to vector<6x128xf32>
      %33 = arith.cmpf ogt, %10, %32 : vector<6x128xf32>
      %cst_14 = arith.constant 0.0099833412 : f32
      %34 = vector.broadcast %cst_14 : f32 to vector<6x128xf32>
      %35 = arith.subf %10, %34 : vector<6x128xf32>
      %36 = arith.select %33, %31, %35 : vector<6x128xi1>, vector<6x128xf32>
      %37 = tpu.iota {dimensions = array<i32: 1>} : vector<6x128xi32>
      %c128_i32 = arith.constant 128 : i32
      %38 = arith.muli %arg0, %c128_i32 : i32
      %39 = vector.broadcast %38 : i32 to vector<6x128xi32>
      %40 = arith.addi %37, %39 : vector<6x128xi32>
      %c0_15 = arith.constant 0 : index
      %c0_16 = arith.constant 0 : index
      %41 = vector.load %arg4[%c0_15, %c0_16] : memref<6x1xi32, #tpu.memory_space<vmem>>, vector<6x1xi32>
      %42 = vector.broadcast %41 : vector<6x1xi32> to vector<6x128xi32>
      %43 = arith.cmpi eq, %40, %42 : vector<6x128xi32>
      %44 = arith.select %43, %36, %10 : vector<6x128xi1>, vector<6x128xf32>
      %cst_17 = arith.constant 8.000000e+00 : f32
      %45 = vector.broadcast %cst_17 : f32 to vector<6x128xf32>
      %46 = arith.mulf %44, %45 : vector<6x128xf32>
      %c0_18 = arith.constant 0 : index
      %c0_19 = arith.constant 0 : index
      %47 = vector.load %arg5[%c0_18, %c0_19] : memref<6x128xf32, #tpu.memory_space<vmem>>, vector<6x128xf32>
      tpu.vector_store %arg5[%c0_18, %c0_19], %46 {strides = array<i32>} : memref<6x128xf32, #tpu.memory_space<vmem>>, vector<6x128xf32>,
    } else {
    }
    %true = arith.constant true
    %16 = arith.xori %13, %true : i1
    %17 = arith.extui %16 : i1 to i32
    %c0_i32_7 = arith.constant 0 : i32
    %18 = arith.cmpi ne, %17, %c0_i32_7 : i32
    scf.if %18 {
      %cst_8 = arith.constant 8.000000e+00 : f32
      %19 = vector.broadcast %cst_8 : f32 to vector<6x128xf32>
      %20 = arith.mulf %10, %19 : vector<6x128xf32>
      %c0_9 = arith.constant 0 : index
      %c0_10 = arith.constant 0 : index
      %21 = vector.load %arg5[%c0_9, %c0_10] : memref<6x128xf32, #tpu.memory_space<vmem>>, vector<6x128xf32>
      tpu.vector_store %arg5[%c0_9, %c0_10], %20 {strides = array<i32>} : memref<6x128xf32, #tpu.memory_space<vmem>>, vector<6x128xf32>,
    } else {
    }
    return
  }
  func.func @transform_0(%arg0: i32, %arg1: memref<2xi32, #tpu.memory_space<smem>>) -> (i32, i32) {
    %c0_i32 = arith.constant 0 : i32
    %c0_i32_0 = arith.constant 0 : i32
    %c0_i32_1 = arith.constant 0 : i32
    return %c0_i32, %c0_i32_0 : i32, i32
  }
  func.func @transform_1(%arg0: i32, %arg1: memref<2xi32, #tpu.memory_space<smem>>) -> (i32, i32) {
    %c0_i32 = arith.constant 0 : i32
    %c0_i32_0 = arith.constant 0 : i32
    return %arg0, %c0_i32 : i32, i32
  }
  func.func @transform_2(%arg0: i32, %arg1: memref<2xi32, #tpu.memory_space<smem>>) -> (i32, i32) {
    %c0_i32 = arith.constant 0 : i32
    %c0_i32_0 = arith.constant 0 : i32
    %c0_i32_1 = arith.constant 0 : i32
    return %c0_i32, %c0_i32_0 : i32, i32
  }
  func.func @transform_3(%arg0: i32, %arg1: memref<2xi32, #tpu.memory_space<smem>>) -> (i32, i32) {
    %c0_i32 = arith.constant 0 : i32
    %c0_i32_0 = arith.constant 0 : i32
    return %c0_i32, %arg0 : i32, i32
  }
}

</mosaic_0001>

<bundles_post_ra>
// kernel: tpu_custom_call.1
= control target key start
LH: loop header
LB: loop body
LE: loop exit
PB: predicated region body
PF: predicated region fallthrough
CT: control target
= control target key end

     0   :  { %s1089_s0 = inlined_call_operand.vmem [shape: s32[2], index: 0, kind: input, shape index: {}]   ;;  %s1090_s1 = inlined_call_operand.vmem [shape: f32[6,128], index: 1, kind: input, shape index: {}]   ;;  %s1091_s2 = inlined_call_operand.hbm [shape: f32[256,128], index: 2, kind: input, shape index: {}]   ;;  %s1092_s3 = inlined_call_operand.vmem [shape: s32[6,1], index: 3, kind: input, shape index: {}]   ;;  %s1093_s4 = inlined_call_operand.hbm [shape: f32[6,256], index: 4, kind: output, shape index: {}]  }
   0x1   :  { %s9_s17 = sshll.u32 %s1089_s0, 4  ;;  %s10_s17 = int_to_ptr.vmem [resolvable:$true] %s9_s17 }
   0x2   :  { %s731_s18 = scalar_lea.vmem %s10_s17, 16  ;;  %p736_p1 = scmp.lt.s32.totalorder %s10_s17, %s10_s17 }
   0x3   :  { %p732_p0 = scmp.ne.s32.totalorder %s10_s17, %s731_s18  ;;  %p737_p2 = scmp.lt.s32.totalorder %s731_s18, %s731_s18 }
   0x5   :  { %p738_p3 = por %p737_p2, %p736_p1 }
   0x7   :  { %p739_p4 = pnand %p738_p3, %p732_p0 }
   0x9   :  { %742 = shalt.err (!%p739_p4)  }
   0xa   :  { %s843_s19 = smov [#allocation3]  }
   0xb   :  { %12 = dma.vmem_to_smem %s10_s17, 16, %s843_s19, [#allocation2] }
   0xc   :  { %817 = dma.done.wait [#allocation2], 16 }
   0xd   :  { %818 = vsyncadd [#allocation2], 4294967280 }
   0xe   :  { %14 = sfence }
   0xf   :  { %15 = vsyncpa [#allocation5], 0 }
  0x10   :  { %17 = vsyncpa [#allocation5 + $0x1], 0 }
  0x11   :  { %18 = vsyncpa [#allocation6], 0 }
  0x12   :  { %20 = vsyncpa [#allocation6 + $0x1], 0  ;;  %s881_s20 = smov 0   ;;  %s883_s0 = smov 0  }
  0x13   :  { %s885_s21 = smov 0   ;;  %s887_s22 = smov 0  }
  0x14 LB: > { %s902_s23 = sadd.s32 4294967295, %s841_s22   ;;  %s502_s24 = sadd.s32 4294967294, %s841_s22   ;;  %s841_s22 = sphi %s887_s22, %s1106_s22   ;;  %s837_s21 = sphi %s885_s21, %s1105_s21   ;;  %s833_s0 = sphi %s883_s0, %s1104_s0   ;;  %s829_s20 = sphi %s881_s20, %s1103_s20  }
  0x15   : > { %s906_s25 = sadd.s32 1, %s841_s22   ;;  %s54_s26 = sadd.s32 1, %s837_s21 }
  0x16   : > { %s51_s27 = ssub.s32 %s841_s22, %s906_s25  ;;  %p61_p5 = scmp.ne.s32.totalorder %s837_s21, %s833_s0 }
  0x17   : > { %p52_p6 = scmp.eq.s32.totalorder %s51_s27, 0  ;;  %p62_p7 = scmp.eq.s32.totalorder %s841_s22, 0 }
  0x18   : > { %p67_p8 = scmp.ne.s32.totalorder %s833_s0, %s829_s20  ;;  %p68_p9 = scmp.eq.s32.totalorder %s902_s23, 0 }
  0x19   : > { %s918_s28 = scalar_select %p52_p6, %s837_s21, %s54_s26  }
  0x1a   : > { %p920_p10 = por %p62_p7, %p61_p5  ;;  %p924_p11 = por %p68_p9, %p67_p8 }
  0x1b   : > { %p112_p12 = scmp.eq.s32.totalorder %s902_s23, 1  ;;  %p118_p13 = scmp.eq.s32.totalorder %s502_s24, 1 }
  0x1c   : > { %p684_p1 = scmp.lt.s32.totalorder %s841_s22, 2  ;;  %s144_s7 = sand.u32 1, %s837_s21  }
  0x1d   : > { %p931_p2 = por %p112_p12, %p61_p5  ;;  %p935_p3 = por %p118_p13, %p67_p8 }
  0x1e   : > { %s519_s8 = sshll.u32 %s841_s22, 11  ;;  %s505_s9 = sshll.u32 %s144_s7, 7 }
  0x1f   : > { %s1097_s5 = scalar_select %p931_p2, 1, 0 }
  0x20   : > { %s1098_s6 = scalar_select %p935_p3, 1, 0 }
  0x21   : > { %s944_s12 = scalar_lea.hbm %s1091_s2, %s519_s8  ;;  %s148_s13 = scalar_lea.vmem [#allocation4], %s505_s9 }
  0x22   : > { %s155_s14 = sshll.u32 %s148_s13, 4  ;;  %p948_p4 = pnand %p684_p1, %p920_p10  ;;  %s952_s14 = int_to_ptr.vmem [resolvable:$true] %s155_s14 }
  0x23   : > { %s954_s16 = scalar_lea.sflag [#allocation5], %s144_s7  ;;  %s743_s17 = scalar_lea.hbm %s944_s12, 2048 }
  0x24   : > { %p744_p5 = scmp.ne.s32.totalorder %s944_s12, %s743_s17  ;;  %p745_p6 = pneg %p948_p4 }
  0x25   : > { %s748_s24 = scalar_lea.hbm %s1091_s2, 4096  ;;  %p749_p9 = scmp.lt.u32.totalorder %s944_s12, %s1091_s2 }
  0x26   : > { %p746_p7 = pnand %p745_p6, %p744_p5  ;;  %p750_p10 = scmp.lt.u32.totalorder %s748_s24, %s743_s17 }
  0x27   : > { %p752_p13 = scmp.lt.u32.totalorder %s743_s17, %s944_s12 }
  0x28   : > { %p747_p8 = pneg %p746_p7  ;;  %p751_p12 = por %p750_p10, %p749_p9 }
  0x2a   : > { %p753_p1 = por %p752_p13, %p751_p12 }
  0x2c   : > { %p754_p0 = pnand %p753_p1, %p747_p8 }
  0x2e   : > { %757 = shalt.err (!%p754_p0)
}
  0x2f   : > { %s758_s29 = scalar_lea.vmem %s952_s14, 2048  ;;  %s844_s7 = smov [#allocation4]  }
  0x30   : > { %p759_p5 = scmp.ne.s32.totalorder %s952_s14, %s758_s29  ;;  %s763_s8 = sshll.u32 %s844_s7, 4  ;;  %s764_s8 = int_to_ptr.vmem [resolvable:$false] %s763_s8 }
  0x31   : > { %s765_s9 = scalar_lea.vmem %s764_s8, 4096  ;;  %p766_p2 = scmp.lt.s32.totalorder %s952_s14, %s764_s8 }
  0x32   : > { %p761_p7 = pnand %p759_p5, %p745_p6  ;;  %p767_p9 = scmp.lt.s32.totalorder %s765_s9, %s758_s29 }
  0x34   : > { %p762_p3 = pneg %p761_p7  ;;  %p768_p10 = por %p767_p9, %p766_p2 }
  0x36   : > { %p769_p12 = pnand %p768_p10, %p762_p3 }
  0x38   : > { %772 = shalt.err (!%p769_p12)
}
  0x39   : > { %s845_s10 = smov 128   ;;  %s846_s11 = smov 8  }
  0x3a   : > { %679 = dma.hbm_to_vmem [thread:$0]  (!%p948_p4), %s944_s12, 2048, %s952_s14, %s954_s16, %s845_s10, %s845_s10, %s846_s11  }
  0x3b   : > { %p508_p0 = scmp.ge.s32.totalorder %s841_s22, 1  ;;  %p163_p6 = scmp.lt.s32.totalorder %s841_s22, 3 }
  0x3d   : > { %p164_p8 = pnand %p508_p0, %p163_p6 }
  0x3e   : > { %s985_s13 = sand.u32 (!%p164_p8), 1, %s833_s0  }
  0x3f   : > { %167 = sbr.rel (%p164_p8) target bundleno = 435 (0x1b3), region = 32  ;;  %s509_s17 = sshll.u32 (!%p164_p8), %s985_s13, 7 }
  0x40   : > { %s170_s18 = scalar_lea.sflag (!%p164_p8), [#allocation5], %s985_s13  ;;  %s989_s19 = scalar_lea.vmem (!%p164_p8), [#allocation4], %s509_s17 }
  0x46   : > { %820 = dma.done.wait (%p924_p11), %s170_s18, 2048  }
  0x47   : > { %822 = vsyncadd (%p924_p11), %s170_s18, 4294965248  ;;  %s510_s12 = sshll.u32 %s985_s13, 3  ;;  %s997_s14 = sld [smem:[#allocation3 + %s902_s23]]  ;;  %v847_v0 = vmov 0.0|0.0   ;;  %vm848_vm0 = vmmov 0   ;;  %v849_v1 = vmov 0.0   ;;  %v372_v57 = vlaneseq }
  0x48   : > { %624 = vmatprep.subr.bf16.mxu0 %v847_v0  ;;  %648 = vmatprep.subr.bf16.mxu1 %v847_v0  ;;  %v198_v2 = vld [vmem:[%s989_s19] sm:$0xff]  ;;  %v199_v3 = vld [vmem:[%s989_s19 + $0x8] sm:$0xff]  ;;  %v200_v7 = vld [vmem:[%s989_s19 + $0x10] sm:$0xff]  ;;  %v850_v51 = vmov 1.0   ;;  %s1036_s16 = scalar_lea.vmem [#allocation7], %s510_s12 }
  0x49   : > { %586 = vmatprep.mubr.msk.f32.mxu0 %vm848_vm0, %v849_v1  ;;  %621 = vmatprep.mubr.msk.f32.mxu1 %vm848_vm0, %v849_v1  ;;  %v214_v4 = vmul.f32 %v198_v2, %v198_v2  ;;  %v215_v5 = vmul.f32 %v199_v3, %v199_v3  ;;  %v649_v6 = vpack.c.bf16 %v199_v3, %v198_v2  ;;  %v201_v8 = vld [vmem:[%s989_s19 + $0x18] sm:$0xff]  ;;  %v202_v14 = vld [vmem:[%s989_s19 + $0x20] sm:$0xff]  ;;  %v203_v15 = vld [vmem:[%s989_s19 + $0x28] sm:$0xff]  ;;  %v373_v58 = vshrl.u32 %v372_v57, 7 }
  0x4a   : > { %v216_v10 = vmul.f32 %v200_v7, %v200_v7  ;;  %v217_v11 = vmul.f32 %v201_v8, %v201_v8  ;;  %v652_v12 = vpack.c.bf16 %v201_v8, %v200_v7  ;;  %v218_v16 = vmul.f32 %v202_v14, %v202_v14  ;;  %v204_v20 = vld [vmem:[%s989_s19 + $0x30] sm:$0xff]  ;;  %v205_v21 = vld [vmem:[%s989_s19 + $0x38] sm:$0xff]  ;;  %v206_v26 = vld [vmem:[%s989_s19 + $0x40] sm:$0xff] }
  0x4b   : > { %v625_v9 = vpack.c.bf16 %v215_v5, %v214_v4  ;;  %650 = vmatpush3.bf16.xpose.msra.mxu1 %v649_v6  ;;  %v219_v17 = vmul.f32 %v203_v15, %v203_v15  ;;  %v655_v18 = vpack.c.bf16 %v203_v15, %v202_v14  ;;  %v220_v22 = vmul.f32 %v204_v20, %v204_v20  ;;  %v207_v27 = vld [vmem:[%s989_s19 + $0x48] sm:$0xff]  ;;  %v208_v32 = vld [vmem:[%s989_s19 + $0x50] sm:$0xff]  ;;  %v209_v33 = vld [vmem:[%s989_s19 + $0x58] sm:$0xff] }
  0x4c   : > { %651 = vmatprep.subr.bf16.mxu1 %v847_v0  ;;  %v628_v13 = vpack.c.bf16 %v217_v11, %v216_v10  ;;  %v221_v23 = vmul.f32 %v205_v21, %v205_v21  ;;  %v658_v24 = vpack.c.bf16 %v205_v21, %v204_v20  ;;  %v222_v28 = vmul.f32 %v206_v26, %v206_v26  ;;  %v210_v38 = vld [vmem:[%s989_s19 + $0x60] sm:$0xff]  ;;  %v211_v39 = vld [vmem:[%s989_s19 + $0x68] sm:$0xff]  ;;  %v212_v44 = vld [vmem:[%s989_s19 + $0x70] sm:$0xff] }
  0x4d   : > { %626 = vmatpush3.bf16.xpose.msra.mxu0 %v625_v9  ;;  %v631_v19 = vpack.c.bf16 %v219_v17, %v218_v16  ;;  %v223_v29 = vmul.f32 %v207_v27, %v207_v27  ;;  %v661_v30 = vpack.c.bf16 %v207_v27, %v206_v26  ;;  %v224_v34 = vmul.f32 %v208_v32, %v208_v32  ;;  %v213_v45 = vld [vmem:[%s989_s19 + $0x78] sm:$0xff]  ;;  %v197_v50 = vld [vmem:[%s1090_s1] sm:$0x3f]  ;;  %p511_p11 = scmp.eq.s32.totalorder %s997_s14, 0 }
  0x4e   : > { %627 = vmatprep.subr.bf16.mxu0 %v847_v0  ;;  %v634_v25 = vpack.c.bf16 %v221_v23, %v220_v22  ;;  %v225_v35 = vmul.f32 %v209_v33, %v209_v33  ;;  %v664_v36 = vpack.c.bf16 %v209_v33, %v208_v32  ;;  %v226_v40 = vmul.f32 %v210_v38, %v210_v38  ;;  %v404_v63 = vld [vmem:[%s1092_s3] sm:$0x3f] (!%p511_p11)  ;;  %s513_s27 = sshll.u32 (!%p511_p11), %s902_s23, 7 }
  0x4f   : > { %v637_v31 = vpack.c.bf16 %v223_v29, %v222_v28  ;;  %v227_v41 = vmul.f32 %v211_v39, %v211_v39  ;;  %v667_v42 = vpack.c.bf16 %v211_v39, %v210_v38  ;;  %v228_v46 = vmul.f32 %v212_v44, %v212_v44 }
  0x50   : > { %v640_v37 = vpack.c.bf16 %v225_v35, %v224_v34  ;;  %v229_v47 = vmul.f32 %v213_v45, %v213_v45  ;;  %v670_v48 = vpack.c.bf16 %v213_v45, %v212_v44  ;;  %v374_v59 = vsub.s32 0, %v373_v58 }
  0x51   : > { %v643_v43 = vpack.c.bf16 %v227_v41, %v226_v40 }
  0x52   : > { %v646_v49 = vpack.c.bf16 %v229_v47, %v228_v46 }
  0x53   : > { %653 = vmatpush3.bf16.xpose.msra.mxu1 %v652_v12  ;;  %v400_v12 = vand.u32 (!%p511_p11), 127, %v372_v57 }
  0x54   : > { %654 = vmatprep.subr.bf16.mxu1 %v847_v0 }
  0x55   : > { %629 = vmatpush3.bf16.xpose.msra.mxu0 %v628_v13  ;;  %v402_v13 = vstv (!%p511_p11), %s513_s27 }
  0x56   : > { %630 = vmatprep.subr.bf16.mxu0 %v847_v0  ;;  %v403_v16 = vadd.s32 (!%p511_p11), %v402_v13, %v400_v12 }
  0x5b   : > { %656 = vmatpush3.bf16.xpose.msra.mxu1 %v655_v18 }
  0x5c   : > { %657 = vmatprep.subr.bf16.mxu1 %v847_v0 }
  0x5d   : > { %632 = vmatpush3.bf16.xpose.msra.mxu0 %v631_v19 }
  0x5e   : > { %633 = vmatprep.subr.bf16.mxu0 %v847_v0 }
  0x63   : > { %659 = vmatpush3.bf16.xpose.msra.mxu1 %v658_v24 }
  0x64   : > { %660 = vmatprep.subr.bf16.mxu1 %v847_v0 }
  0x65   : > { %635 = vmatpush3.bf16.xpose.msra.mxu0 %v634_v25 }
  0x66   : > { %636 = vmatprep.subr.bf16.mxu0 %v847_v0 }
  0x6b   : > { %662 = vmatpush3.bf16.xpose.msra.mxu1 %v661_v30 }
  0x6c   : > { %663 = vmatprep.subr.bf16.mxu1 %v847_v0 }
  0x6d   : > { %638 = vmatpush3.bf16.xpose.msra.mxu0 %v637_v31 }
  0x6e   : > { %639 = vmatprep.subr.bf16.mxu0 %v847_v0 }
  0x73   : > { %665 = vmatpush3.bf16.xpose.msra.mxu1 %v664_v36 }
  0x74   : > { %666 = vmatprep.subr.bf16.mxu1 %v847_v0 }
  0x75   : > { %641 = vmatpush3.bf16.xpose.msra.mxu0 %v640_v37 }
  0x76   : > { %642 = vmatprep.subr.bf16.mxu0 %v847_v0 }
  0x7b   : > { %668 = vmatpush3.bf16.xpose.msra.mxu1 %v667_v42 }
  0x7c   : > { %669 = vmatprep.subr.bf16.mxu1 %v847_v0 }
  0x7d   : > { %644 = vmatpush3.bf16.xpose.msra.mxu0 %v643_v43 }
  0x7e   : > { %645 = vmatprep.subr.bf16.mxu0 %v847_v0  ;;  %v851_v0 = vmov (!%p511_p11), 0  }
  0x7f   : > { %728 = vset.pattern.permute.xlu0 (!%p511_p11), %v851_v0 }
  0x80   : > { %406 = vperm.xlu0 (!%p511_p11), %728, %v404_v63  }
  0x83   : > { %671 = vmatpush3.bf16.xpose.msra.mxu1 %v670_v48 }
  0x85   : > { %647 = vmatpush3.bf16.xpose.msra.mxu0 %v646_v49 }
  0x8a   : > { %622 = vmatmul.mubr.f32.vlgmr.msra.gmra.mrb[0].mxu1 %v197_v50 }
  0x8c   : > { %587 = vmatmul.mubr.f32.vlgmr.msra.gmra.mrb[0].mxu0 %v850_v51 }
  0xff   : > { %v407_v18 = vpop.permute.xlu0 (!%p511_p11), %406 }
 0x100   : > { %vm408_vm4 = vcmp.eq.s32.totalorder (!%p511_p11), %v403_v16, %v407_v18 }
 0x15d   : > { %v368_v52 = vpop.f32.mrb[0].mxu1 }
 0x15e   : > { %v623_v53 = vpop.f32.mrb[1].mxu1 }
 0x15f   : > { %v296_v54 = vpop.f32.mrb[0].mxu0 }
 0x160   : > { %v300_v55 = vmax.f32 %v296_v54, 1e-24  ;;  %v588_v56 = vpop.f32.mrb[1].mxu0 }
 0x162   : > { %726 = vrsqrt.f32 %v300_v55 }
 0x169   : > { %381 = sbr.rel (%p511_p11) target bundleno = 401 (0x191), region = 40 }
 0x16c   : > { %v727_v60 = vpop.eup %726 }
 0x16d   : > { %v375_v61 = vrot.slane %v727_v60, %v374_v59 }
 0x16f   : > { %v376_v62 = vmul.f32 %v375_v61, %v368_v52 }
 0x171   : > { %v382_v1 = vmul.f32 %v376_v62, %v376_v62  ;;  %v393_v10 = vmul.f32 0.9950042, %v376_v62  ;;  %v512_v15 = vadd.f32 -0.009983341, %v376_v62  ;;  %vm396_vm3 = vcmp.gt.f32.partialorder %v376_v62, -0.9950042 }
 0x173   : > { %v383_v2 = vsub.f32 1.0, %v382_v1 }
 0x175   : > { %v384_v3 = vmax.f32 %v383_v2, 0.0 }
 0x177   : > { %v385_v4 = vmin.f32 %v384_v3, 1.0 }
 0x179   : > { %729 = vrsqrt.f32 %v385_v4  ;;  %vm388_vm1 = vcmp.eq.f32.partialorder %v385_v4, inf  ;;  %v391_v7 = vand.u32 2147483648, %v385_v4  ;;  %vm390_vm2 = vcmp.eq.f32.partialorder %v385_v4, 0.0 }
 0x183   : > { %v730_v5 = vpop.eup %729 }
 0x184   : > { %v387_v6 = vmul.f32 %v730_v5, %v385_v4 }
 0x186   : > { %v389_v8 = vsel %vm388_vm1, %v385_v4, %v387_v6 }
 0x187   : > { %v392_v9 = vsel %vm390_vm2, %v391_v7, %v389_v8 }
 0x188   : > { %v394_v11 = vmul.f32 0.099833414, %v392_v9 }
 0x18a   : > { %v395_v14 = vsub.f32 %v393_v10, %v394_v11 }
 0x18c   : > { %v398_v17 = vsel %vm396_vm3, %v395_v14, %v512_v15 }
 0x18d   : > { %v409_v19 = vsel %vm408_vm4, %v398_v17, %v376_v62 }
 0x18e   : > { %v410_v20 = vmul.f32 8.0, %v409_v19 }
 0x190   : > { %411 = vst [vmem:[%s1036_s16] sm:$0x3f] %v410_v20 }
 0x191 PF: > { %p514_p2 = scmp.ne.s32.totalorder %s997_s14, 0 }
 0x192   : > { %v416_v21 = vmul.f32 (!%p514_p2), 8.0, %v376_v62 }
 0x193   : > { %415 = sbr.rel (%p514_p2) target bundleno = 410 (0x19a), region = 44 }
 0x194   : > { %417 = vst [vmem:[%s1036_s16] sm:$0x3f] (!%p514_p2), %v416_v21 }
 0x19a PF: > { %s516_s29 = sshll.u32 %s902_s23, 7  ;;  %s432_s10 = sshll.u32 %s1036_s16, 4  ;;  %s433_s10 = int_to_ptr.vmem [resolvable:$true] %s432_s10 }
 0x19b   : > { %s1050_s9 = scalar_lea.hbm %s1093_s4, %s516_s29  ;;  %s419_s11 = scalar_lea.sflag [#allocation6], %s985_s13 }
 0x19c   : > { %s773_s17 = scalar_lea.vmem %s433_s10, 128  ;;  %p1100_p4 = scmp.ne.s32.totalorder %s1097_s5, 0 }
 0x19d   : > { %p774_p3 = scmp.ne.s32.totalorder %s433_s10, %s773_s17  ;;  %s852_s18 = smov [#allocation7]  }
 0x19e   : > { %s777_s19 = sshll.u32 %s852_s18, 4  ;;  %s778_s19 = int_to_ptr.vmem [resolvable:$false] %s777_s19 }
 0x19f   : > { %p775_p13 = pnand %p774_p3, %p1100_p4  ;;  %s779_s12 = scalar_lea.vmem %s778_s19, 256 }
 0x1a0   : > { %p780_p5 = scmp.lt.s32.totalorder %s433_s10, %s778_s19  ;;  %p781_p7 = scmp.lt.s32.totalorder %s779_s12, %s773_s17 }
 0x1a1   : > { %p776_p1 = pneg %p775_p13 }
 0x1a2   : > { %p782_p9 = por %p781_p7, %p780_p5 }
 0x1a4   : > { %p783_p10 = pnand %p782_p9, %p776_p1 }
 0x1a6   : > { %786 = shalt.err (!%p783_p10)
}
 0x1a7   : > { %s787_s23 = scalar_lea.hbm %s1050_s9, 128  ;;  %s791_s30 = scalar_lea.hbm %s1093_s4, 256 }
 0x1a8   : > { %p788_p12 = scmp.ne.s32.totalorder %s1050_s9, %s787_s23  ;;  %p792_p8 = scmp.lt.u32.totalorder %s1050_s9, %s1093_s4 }
 0x1a9   : > { %p793_p11 = scmp.lt.u32.totalorder %s791_s30, %s787_s23  ;;  %p795_p3 = scmp.lt.u32.totalorder %s787_s23, %s1050_s9 }
 0x1aa   : > { %p789_p0 = pnand %p788_p12, %p1100_p4 }
 0x1ab   : > { %p794_p2 = por %p793_p11, %p792_p8 }
 0x1ac   : > { %p790_p6 = pneg %p789_p0 }
 0x1ad   : > { %p796_p13 = por %p795_p3, %p794_p2 }
 0x1af   : > { %p797_p1 = pnand %p796_p13, %p790_p6 }
 0x1b1   : > { %800 = shalt.err (!%p797_p1)
}
 0x1b2   : > { %674 = dma.vmem_to_hbm [thread:$0]  (%p1100_p4), %s433_s10, 128, %s1050_s9, %s419_s11  }
 0x1b3 PF: > { %s444_s24 = sand.u32 1, %s829_s20   ;;  %p1101_p5 = scmp.ne.s32.totalorder %s1098_s6, 0 }
 0x1b4   : > { %p1102_p7 = scmp.ge.s32.totalorder %s841_s22, 2  ;;  %s445_s26 = scalar_lea.sflag [#allocation6], %s444_s24 }
 0x1b6   : > { %p681_p9 = pnand %p1102_p7, %p1101_p5 }
 0x1b8   : > { %824 = dma.done.wait (!%p681_p9), %s445_s26, 128  }
 0x1b9   : > { %826 = vsyncadd (!%p681_p9), %s445_s26, 4294967168  ;;  %p23_p10 = scmp.ge.s32.totalorder %s906_s25, 4   ;;  %s1103_s20 = smov %s833_s0 }
 0x1ba   : > { %s1104_s0 = smov %s837_s21  ;;  %s1105_s21 = smov %s918_s28 }
 0x1bb   : > { %s1106_s22 = smov %s906_s25  ;;  %25 = sbr.rel (!%p23_p10) target bundleno = 20 (0x14), region = 85 }
 0x1c2   :  { %450 = vsyncpa [#allocation5], 1 }
 0x1c3   :  { %452 = vsyncpa [#allocation5 + $0x1], 1 }
 0x1c4   :  { %453 = vsyncpa [#allocation6], 1 }
 0x1c5   :  { %455 = vsyncpa [#allocation6 + $0x1], 1 }

</bundles_post_ra>
